<compile_context>
chip_gen: v5e
topology: v5e:2x2
jax: 0.10.0
libtpu: 0.0.40
codegen_flags: <defaults>
</compile_context>

<pallas_src>
import functools

import jax
import jax.numpy as jnp
from jax.experimental import pallas as pl
from jax.experimental.pallas import tpu as pltpu


_LANE = 128                               # channel dims padded to multiples of this
_VMEM_TILE_BUDGET = 20 * 1024 * 1024      # target resident bytes per grid step
_VMEM_LIMIT_FLOOR = 32 * 1024 * 1024
_VMEM_LIMIT_CAP = 48 * 1024 * 1024        # safe on v7x (64 MiB physical VMEM)


def _round_up(x, m):
    return (x + m - 1) // m * m


def _sepconv_kernel(x_ref, wdw_ref, wpw_ref, o_ref, *,
                    kh, kw, dilation, tile_h, wo, pregathered):
    """One grid step = one (batch, output-row-strip) tile.

    x_ref  : (1, tile_h + halo, Wp, Cin)        when pregathered is False (stride == 1)
             (1, kh*kw*tile_h, Wo, Cin)         when pregathered is True  (stride > 1)
    wdw_ref: (KH, KW, Cin)   depthwise weights
    wpw_ref: (Cin, Cout)     pointwise weights
    o_ref  : (1, tile_h, Wo, Cout)
    """
    cin = x_ref.shape[-1]
    in_dtype = x_ref.dtype
    # bf16 stays bf16 for the per-tap multiplies / MXU feed (native on v6e/v7x);
    # everything else computes in f32.  Accumulation is always f32.
    compute_dtype = jnp.bfloat16 if in_dtype == jnp.bfloat16 else jnp.float32

    acc = jnp.zeros((tile_h, wo, cin), jnp.float32)

    if pregathered:
        # stride > 1: strided rows/cols were gathered by the wrapper, so every
        # load here is a contiguous slice on a non-layout dim.
        for i in range(kh):
            for j in range(kw):
                xij = x_ref[0, pl.ds((i * kw + j) * tile_h, tile_h)]   # (tile_h, Wo, Cin)
                tap = wdw_ref[i, j, :].astype(compute_dtype)
                acc = acc + (xij.astype(compute_dtype) * tap).astype(jnp.float32)
    else:
        # stride == 1: hoist the W-axis (sublane) shift out of the tap loop —
        # one shifted load per kernel column, reused across the kh row taps.
        for j in range(kw):
            xj = x_ref[0, :, pl.ds(j * dilation, wo), :]               # (th_in, Wo, Cin)
            for i in range(kh):
                rows = xj[i * dilation:i * dilation + tile_h]          # (tile_h, Wo, Cin)
                tap = wdw_ref[i, j, :].astype(compute_dtype)
                acc = acc + (rows.astype(compute_dtype) * tap).astype(jnp.float32)

    # Pointwise 1x1 conv: one (tile_h*Wo, Cin) x (Cin, Cout) matmul on the MXU.
    # The reshape is a layout-free sublane merge whenever Wo % 8 == 0.
    wpw = wpw_ref[...]
    lhs = acc.reshape(tile_h * wo, cin)
    if compute_dtype == jnp.bfloat16:
        lhs = lhs.astype(jnp.bfloat16)
        wpw = wpw.astype(jnp.bfloat16)
    out = jnp.dot(lhs, wpw, preferred_element_type=jnp.float32)
    o_ref[0] = out.reshape(tile_h, wo, wpw.shape[-1]).astype(o_ref.dtype)


def separable_conv2d(x_nchw, w_depthwise, w_pointwise, *,
                     kernel_size, stride=1, padding=0, dilation=1, tile_h=None):
    """Forward pass of SeparableConv2d (bias=False, as in the module).

    x_nchw      : (N, Cin, H, W)
    w_depthwise : (Cin, 1, KH, KW)   -- PyTorch conv1.weight layout (groups=Cin)
    w_pointwise : (Cout, Cin, 1, 1)  -- PyTorch pointwise.weight layout
    returns     : (N, Cout, Ho, Wo)
    """
    n, cin, h, w = x_nchw.shape
    cout = w_pointwise.shape[0]
    kh = kw = int(kernel_size)
    halo = (kh - 1) * dilation
    ho = (h + 2 * padding - dilation * (kh - 1) - 1) // stride + 1
    wo = (w + 2 * padding - dilation * (kw - 1) - 1) // stride + 1
    wp = w + 2 * padding

    # Lane-dense channel layout (unmasked stores, full MXU K/N).
    cin_p = _round_up(cin, _LANE)
    cout_p = _round_up(cout, _LANE)
    in_itemsize = jnp.dtype(x_nchw.dtype).itemsize

    # ---- pick the output-row strip height so everything fits in VMEM --------
    def vmem_estimate(th):
        if stride == 1:
            rows = th + halo
            in_blk = rows * wp * cin_p * in_itemsize
            tap = rows * wo * cin_p * in_itemsize        # one live shifted W view
        else:
            rows = kh * kw * th
            in_blk = rows * wo * cin_p * in_itemsize
            tap = th * wo * cin_p * in_itemsize
        out_blk = th * wo * cout_p * in_itemsize
        acc = th * wo * cin_p * 4
        dot = th * wo * cout_p * 4
        wts = 2 * (kh * kw * cin_p + cin_p * cout_p) * 4
        # inputs/outputs are double-buffered by the BlockSpec pipeline
        return 2 * in_blk + 2 * out_blk + acc + tap + dot + wts

    if tile_h is None:
        tile_h = ho
        while tile_h > 1 and vmem_estimate(tile_h) > _VMEM_TILE_BUDGET:
            tile_h = (tile_h + 1) // 2
    tile_h = max(1, min(int(tile_h), ho))
    num_strips = -(-ho // tile_h)
    ho_pad = num_strips * tile_h

    # ---- glue: NCHW -> NHWC, channel pad, spatial pad, strip gather ----------
    x = jnp.transpose(x_nchw, (0, 2, 3, 1))                          # (N, H, W, Cin)
    x = jnp.pad(x, ((0, 0), (0, 0), (0, 0), (0, cin_p - cin)))

    hp_needed = (ho_pad - 1) * stride + halo + 1
    pad_h_hi = max(0, hp_needed - padding - h)
    x = jnp.pad(x, ((0, 0), (padding, pad_h_hi), (padding, padding), (0, 0)))

    if stride == 1:
        th_in = tile_h + halo
        row_idx = (jnp.arange(num_strips)[:, None] * tile_h
                   + jnp.arange(th_in)[None, :])                     # (S, th_in)
        xs = jnp.take(x, row_idx, axis=1)                            # (N, S, th_in, Wp, C)
        xs = xs.reshape(n * num_strips, th_in, wp, cin_p)
        in_block = (1, th_in, wp, cin_p)
        pregathered = False
    else:
        # Bake the W/H strides into a wrapper-side gather (one HBM relayout)
        # so the kernel never strided-slices the sublane axis.
        widx = (jnp.arange(kw)[:, None] * dilation
                + jnp.arange(wo)[None, :] * stride)                  # (kw, Wo)
        xg = jnp.take(x, widx, axis=2)                               # (N, Hp, kw, Wo, C)
        ridx = (jnp.arange(num_strips)[:, None, None] * (tile_h * stride)
                + jnp.arange(kh)[None, :, None] * dilation
                + jnp.arange(tile_h)[None, None, :] * stride)        # (S, kh, tile_h)
        xs = jnp.take(xg, ridx, axis=1)                              # (N, S, kh, tile_h, kw, Wo, C)
        xs = jnp.transpose(xs, (0, 1, 2, 4, 3, 5, 6))                # (N, S, kh, kw, tile_h, Wo, C)
        xs = xs.reshape(n * num_strips, kh * kw * tile_h, wo, cin_p)
        in_block = (1, kh * kw * tile_h, wo, cin_p)
        pregathered = True

    # Weights -> kernel layout, zero-padded to the lane-dense channel dims.
    wdw = jnp.transpose(w_depthwise[:, 0, :, :], (1, 2, 0))          # (KH, KW, Cin)
    wdw = jnp.pad(wdw, ((0, 0), (0, 0), (0, cin_p - cin)))
    wpw = jnp.transpose(w_pointwise[:, :, 0, 0], (1, 0))             # (Cin, Cout)
    wpw = jnp.pad(wpw, ((0, cin_p - cin), (0, cout_p - cout)))

    kernel = functools.partial(_sepconv_kernel, kh=kh, kw=kw, dilation=dilation,
                               tile_h=tile_h, wo=wo, pregathered=pregathered)

    flops = 2 * n * ho_pad * wo * cin_p * (kh * kw + cout_p)
    bytes_accessed = (int(xs.size) * in_itemsize
                      + int(wdw.size) * jnp.dtype(wdw.dtype).itemsize
                      + int(wpw.size) * jnp.dtype(wpw.dtype).itemsize
                      + n * ho_pad * wo * cout_p * in_itemsize)
    cost = pl.CostEstimate(flops=flops, transcendentals=0,
                           bytes_accessed=bytes_accessed)

    vmem_limit = min(_VMEM_LIMIT_CAP,
                     max(_VMEM_LIMIT_FLOOR, int(1.5 * vmem_estimate(tile_h))))

    out = pl.pallas_call(
        kernel,
        out_shape=jax.ShapeDtypeStruct((n * num_strips, tile_h, wo, cout_p),
                                       x_nchw.dtype),
        grid_spec=pltpu.PrefetchScalarGridSpec(
            num_scalar_prefetch=0,
            grid=(n * num_strips,),
            in_specs=[
                pl.BlockSpec(in_block, lambda s: (s, 0, 0, 0)),
                pl.BlockSpec((kh, kw, cin_p), lambda s: (0, 0, 0)),
                pl.BlockSpec((cin_p, cout_p), lambda s: (0, 0)),
            ],
            out_specs=pl.BlockSpec((1, tile_h, wo, cout_p),
                                   lambda s: (s, 0, 0, 0)),
        ),
        compiler_params=pltpu.CompilerParams(
            dimension_semantics=("parallel",),     # strips + batch feed both TCs on v7x
            vmem_limit_bytes=vmem_limit),
        cost_estimate=cost,
    )(xs, wdw, wpw)

    out = out.reshape(n, ho_pad, wo, cout_p)[:, :ho, :, :cout]
    return jnp.transpose(out, (0, 3, 1, 2))


def _reference(x_nchw, w_depthwise, w_pointwise, *, stride, padding, dilation):
    """Pure-JAX reference using lax.conv_general_dilated (NCHW, like PyTorch)."""
    cin = x_nchw.shape[1]
    dw = jax.lax.conv_general_dilated(
        x_nchw, w_depthwise,
        window_strides=(stride, stride),
        padding=((padding, padding), (padding, padding)),
        rhs_dilation=(dilation, dilation),
        feature_group_count=cin,
        dimension_numbers=("NCHW", "OIHW", "NCHW"))
    pw = jax.lax.conv_general_dilated(
        dw, w_pointwise,
        window_strides=(1, 1), padding="VALID",
        dimension_numbers=("NCHW", "OIHW", "NCHW"))
    return pw


if __name__ == "__main__":
    def _check(n, cin, cout, h, w, k, stride, pad, dil, tile_h, key):
        kx, kd, kp = jax.random.split(key, 3)
        x = jax.random.normal(kx, (n, cin, h, w), dtype=jnp.float32)
        w_dw = jax.random.normal(kd, (cin, 1, k, k), dtype=jnp.float32) * 0.1
        w_pw = jax.random.normal(kp, (cout, cin, 1, 1), dtype=jnp.float32) * 0.1
        out = separable_conv2d(x, w_dw, w_pw, kernel_size=k, stride=stride,
                               padding=pad, dilation=dil, tile_h=tile_h)
        out = jax.block_until_ready(out)
        ref = _reference(x, w_dw, w_pw, stride=stride, padding=pad, dilation=dil)
        assert out.shape == ref.shape, (out.shape, ref.shape)
        err = jnp.max(jnp.abs(out - ref))
        assert jnp.allclose(out, ref, atol=1e-4, rtol=1e-4), \
            f"mismatch vs reference (max abs err {err})"

    key = jax.random.PRNGKey(0)
    k0, k1 = jax.random.split(key)
    # Case 1: the exact config XceptionHourglass uses for SeparableConv2d
    # (3x3, stride 1, pad 1), with a ragged row-strip tiling
    # (Ho=16, tile_h=6 -> 3 strips, padded tail rows discarded).
    _check(2, 4, 8, 16, 16, 3, 1, 1, 1, 6, k0)
    # Case 2: generic stride/dilation path (taps pre-gathered by the wrapper).
    _check(2, 4, 8, 16, 16, 3, 2, 2, 2, None, k1)

    print("KERNEL_OK")
</pallas_src>

<mosaic_0001>
module attributes {stable_mosaic.version = 11 : i64} {
  func.func @_sepconv_kernel(%arg0: i32, %arg1: memref<1x8x18x128xf32, #tpu.memory_space<vmem>>, %arg2: memref<3x3x128xf32, #tpu.memory_space<vmem>>, %arg3: memref<128x128xf32, #tpu.memory_space<vmem>>, %arg4: memref<1x6x16x128xf32, #tpu.memory_space<vmem>>) attributes {dimension_semantics = [#tpu.dimension_semantics<parallel>], iteration_bounds = array<i64: 6>, scalar_prefetch = 0 : i64, scratch_operands = 0 : i64, tpu.core_type = #tpu.core_type<tc>, window_params = [{transform_indices = @transform_0, window_bounds = array<i64: 1, 8, 18, 128>}, {pipeline_mode = #tpu.pipeline_mode<synchronous>, transform_indices = @transform_1, window_bounds = array<i64: 3, 3, 128>}, {pipeline_mode = #tpu.pipeline_mode<synchronous>, transform_indices = @transform_2, window_bounds = array<i64: 128, 128>}, {transform_indices = @transform_3, window_bounds = array<i64: 1, 6, 16, 128>}]} {
    %cst = arith.constant 0.000000e+00 : f32
    %0 = vector.broadcast %cst : f32 to vector<6x16x128xf32>
    %c0 = arith.constant 0 : index
    %c0_0 = arith.constant 0 : index
    %c0_1 = arith.constant 0 : index
    %c0_2 = arith.constant 0 : index
    %1 = vector.load %arg1[%c0, %c0_0, %c0_1, %c0_2] : memref<1x8x18x128xf32, #tpu.memory_space<vmem>>, vector<1x8x16x128xf32>
    %2 = vector.shape_cast %1 : vector<1x8x16x128xf32> to vector<8x16x128xf32>
    %3 = vector.extract_strided_slice %2 {offsets = [0, 0, 0], sizes = [6, 16, 128], strides = [1, 1, 1]} : vector<8x16x128xf32> to vector<6x16x128xf32>
    %c0_3 = arith.constant 0 : index
    %c0_4 = arith.constant 0 : index
    %c0_5 = arith.constant 0 : index
    %4 = vector.load %arg2[%c0_3, %c0_4, %c0_5] : memref<3x3x128xf32, #tpu.memory_space<vmem>>, vector<1x1x128xf32>
    %5 = vector.shape_cast %4 : vector<1x1x128xf32> to vector<128xf32>
    %6 = vector.shape_cast %5 : vector<128xf32> to vector<1x1x128xf32>
    %7 = vector.broadcast %6 : vector<1x1x128xf32> to vector<6x16x128xf32>
    %8 = arith.mulf %3, %7 : vector<6x16x128xf32>
    %9 = arith.addf %0, %8 : vector<6x16x128xf32>
    %10 = vector.extract_strided_slice %2 {offsets = [1, 0, 0], sizes = [6, 16, 128], strides = [1, 1, 1]} : vector<8x16x128xf32> to vector<6x16x128xf32>
    %c1 = arith.constant 1 : index
    %c0_6 = arith.constant 0 : index
    %c0_7 = arith.constant 0 : index
    %11 = vector.load %arg2[%c1, %c0_6, %c0_7] : memref<3x3x128xf32, #tpu.memory_space<vmem>>, vector<1x1x128xf32>
    %12 = vector.shape_cast %11 : vector<1x1x128xf32> to vector<128xf32>
    %13 = vector.shape_cast %12 : vector<128xf32> to vector<1x1x128xf32>
    %14 = vector.broadcast %13 : vector<1x1x128xf32> to vector<6x16x128xf32>
    %15 = arith.mulf %10, %14 : vector<6x16x128xf32>
    %16 = arith.addf %9, %15 : vector<6x16x128xf32>
    %17 = vector.extract_strided_slice %2 {offsets = [2, 0, 0], sizes = [6, 16, 128], strides = [1, 1, 1]} : vector<8x16x128xf32> to vector<6x16x128xf32>
    %c2 = arith.constant 2 : index
    %c0_8 = arith.constant 0 : index
    %c0_9 = arith.constant 0 : index
    %18 = vector.load %arg2[%c2, %c0_8, %c0_9] : memref<3x3x128xf32, #tpu.memory_space<vmem>>, vector<1x1x128xf32>
    %19 = vector.shape_cast %18 : vector<1x1x128xf32> to vector<128xf32>
    %20 = vector.shape_cast %19 : vector<128xf32> to vector<1x1x128xf32>
    %21 = vector.broadcast %20 : vector<1x1x128xf32> to vector<6x16x128xf32>
    %22 = arith.mulf %17, %21 : vector<6x16x128xf32>
    %23 = arith.addf %16, %22 : vector<6x16x128xf32>
    %c0_10 = arith.constant 0 : index
    %c0_11 = arith.constant 0 : index
    %c1_12 = arith.constant 1 : index
    %c0_13 = arith.constant 0 : index
    %24 = vector.load %arg1[%c0_10, %c0_11, %c1_12, %c0_13] : memref<1x8x18x128xf32, #tpu.memory_space<vmem>>, vector<1x8x16x128xf32>
    %25 = vector.shape_cast %24 : vector<1x8x16x128xf32> to vector<8x16x128xf32>
    %26 = vector.extract_strided_slice %25 {offsets = [0, 0, 0], sizes = [6, 16, 128], strides = [1, 1, 1]} : vector<8x16x128xf32> to vector<6x16x128xf32>
    %c0_14 = arith.constant 0 : index
    %c1_15 = arith.constant 1 : index
    %c0_16 = arith.constant 0 : index
    %27 = vector.load %arg2[%c0_14, %c1_15, %c0_16] : memref<3x3x128xf32, #tpu.memory_space<vmem>>, vector<1x1x128xf32>
    %28 = vector.shape_cast %27 : vector<1x1x128xf32> to vector<128xf32>
    %29 = vector.shape_cast %28 : vector<128xf32> to vector<1x1x128xf32>
    %30 = vector.broadcast %29 : vector<1x1x128xf32> to vector<6x16x128xf32>
    %31 = arith.mulf %26, %30 : vector<6x16x128xf32>
    %32 = arith.addf %23, %31 : vector<6x16x128xf32>
    %33 = vector.extract_strided_slice %25 {offsets = [1, 0, 0], sizes = [6, 16, 128], strides = [1, 1, 1]} : vector<8x16x128xf32> to vector<6x16x128xf32>
    %c1_17 = arith.constant 1 : index
    %c1_18 = arith.constant 1 : index
    %c0_19 = arith.constant 0 : index
    %34 = vector.load %arg2[%c1_17, %c1_18, %c0_19] : memref<3x3x128xf32, #tpu.memory_space<vmem>>, vector<1x1x128xf32>
    %35 = vector.shape_cast %34 : vector<1x1x128xf32> to vector<128xf32>
    %36 = vector.shape_cast %35 : vector<128xf32> to vector<1x1x128xf32>
    %37 = vector.broadcast %36 : vector<1x1x128xf32> to vector<6x16x128xf32>
    %38 = arith.mulf %33, %37 : vector<6x16x128xf32>
    %39 = arith.addf %32, %38 : vector<6x16x128xf32>
    %40 = vector.extract_strided_slice %25 {offsets = [2, 0, 0], sizes = [6, 16, 128], strides = [1, 1, 1]} : vector<8x16x128xf32> to vector<6x16x128xf32>
    %c2_20 = arith.constant 2 : index
    %c1_21 = arith.constant 1 : index
    %c0_22 = arith.constant 0 : index
    %41 = vector.load %arg2[%c2_20, %c1_21, %c0_22] : memref<3x3x128xf32, #tpu.memory_space<vmem>>, vector<1x1x128xf32>
    %42 = vector.shape_cast %41 : vector<1x1x128xf32> to vector<128xf32>
    %43 = vector.shape_cast %42 : vector<128xf32> to vector<1x1x128xf32>
    %44 = vector.broadcast %43 : vector<1x1x128xf32> to vector<6x16x128xf32>
    %45 = arith.mulf %40, %44 : vector<6x16x128xf32>
    %46 = arith.addf %39, %45 : vector<6x16x128xf32>
    %c0_23 = arith.constant 0 : index
    %c0_24 = arith.constant 0 : index
    %c2_25 = arith.constant 2 : index
    %c0_26 = arith.constant 0 : index
    %47 = vector.load %arg1[%c0_23, %c0_24, %c2_25, %c0_26] : memref<1x8x18x128xf32, #tpu.memory_space<vmem>>, vector<1x8x16x128xf32>
    %48 = vector.shape_cast %47 : vector<1x8x16x128xf32> to vector<8x16x128xf32>
    %49 = vector.extract_strided_slice %48 {offsets = [0, 0, 0], sizes = [6, 16, 128], strides = [1, 1, 1]} : vector<8x16x128xf32> to vector<6x16x128xf32>
    %c0_27 = arith.constant 0 : index
    %c2_28 = arith.constant 2 : index
    %c0_29 = arith.constant 0 : index
    %50 = vector.load %arg2[%c0_27, %c2_28, %c0_29] : memref<3x3x128xf32, #tpu.memory_space<vmem>>, vector<1x1x128xf32>
    %51 = vector.shape_cast %50 : vector<1x1x128xf32> to vector<128xf32>
    %52 = vector.shape_cast %51 : vector<128xf32> to vector<1x1x128xf32>
    %53 = vector.broadcast %52 : vector<1x1x128xf32> to vector<6x16x128xf32>
    %54 = arith.mulf %49, %53 : vector<6x16x128xf32>
    %55 = arith.addf %46, %54 : vector<6x16x128xf32>
    %56 = vector.extract_strided_slice %48 {offsets = [1, 0, 0], sizes = [6, 16, 128], strides = [1, 1, 1]} : vector<8x16x128xf32> to vector<6x16x128xf32>
    %c1_30 = arith.constant 1 : index
    %c2_31 = arith.constant 2 : index
    %c0_32 = arith.constant 0 : index
    %57 = vector.load %arg2[%c1_30, %c2_31, %c0_32] : memref<3x3x128xf32, #tpu.memory_space<vmem>>, vector<1x1x128xf32>
    %58 = vector.shape_cast %57 : vector<1x1x128xf32> to vector<128xf32>
    %59 = vector.shape_cast %58 : vector<128xf32> to vector<1x1x128xf32>
    %60 = vector.broadcast %59 : vector<1x1x128xf32> to vector<6x16x128xf32>
    %61 = arith.mulf %56, %60 : vector<6x16x128xf32>
    %62 = arith.addf %55, %61 : vector<6x16x128xf32>
    %63 = vector.extract_strided_slice %48 {offsets = [2, 0, 0], sizes = [6, 16, 128], strides = [1, 1, 1]} : vector<8x16x128xf32> to vector<6x16x128xf32>
    %c2_33 = arith.constant 2 : index
    %c2_34 = arith.constant 2 : index
    %c0_35 = arith.constant 0 : index
    %64 = vector.load %arg2[%c2_33, %c2_34, %c0_35] : memref<3x3x128xf32, #tpu.memory_space<vmem>>, vector<1x1x128xf32>
    %65 = vector.shape_cast %64 : vector<1x1x128xf32> to vector<128xf32>
    %66 = vector.shape_cast %65 : vector<128xf32> to vector<1x1x128xf32>
    %67 = vector.broadcast %66 : vector<1x1x128xf32> to vector<6x16x128xf32>
    %68 = arith.mulf %63, %67 : vector<6x16x128xf32>
    %69 = arith.addf %62, %68 : vector<6x16x128xf32>
    %c0_36 = arith.constant 0 : index
    %c0_37 = arith.constant 0 : index
    %70 = vector.load %arg3[%c0_36, %c0_37] : memref<128x128xf32, #tpu.memory_space<vmem>>, vector<128x128xf32>
    %71 = vector.shape_cast %69 : vector<6x16x128xf32> to vector<96x128xf32>
    %cst_38 = arith.constant dense<0.000000e+00> : vector<96x128xf32>
    %72 = tpu.matmul %71, %70, %cst_38 {dimension_numbers = #tpu.dot_dimension_numbers<[1], [0], [0], [1], [0, 0, 1, 1], [], []>} : vector<96x128xf32>, vector<128x128xf32>, vector<96x128xf32> -> vector<96x128xf32>
    %73 = vector.shape_cast %72 : vector<96x128xf32> to vector<6x16x128xf32>
    %c0_39 = arith.constant 0 : index
    %c0_40 = arith.constant 0 : index
    %c0_41 = arith.constant 0 : index
    %c0_42 = arith.constant 0 : index
    %74 = vector.load %arg4[%c0_39, %c0_40, %c0_41, %c0_42] : memref<1x6x16x128xf32, #tpu.memory_space<vmem>>, vector<1x6x16x128xf32>
    %75 = vector.shape_cast %74 : vector<1x6x16x128xf32> to vector<6x16x128xf32>
    %76 = vector.shape_cast %73 : vector<6x16x128xf32> to vector<1x6x16x128xf32>
    tpu.vector_store %arg4[%c0_39, %c0_40, %c0_41, %c0_42], %76 {strides = array<i32>} : memref<1x6x16x128xf32, #tpu.memory_space<vmem>>, vector<1x6x16x128xf32>,
    return
  }
  func.func @transform_0(%arg0: i32) -> (i32, i32, i32, i32) {
    %c0_i32 = arith.constant 0 : i32
    %c0_i32_0 = arith.constant 0 : i32
    %c0_i32_1 = arith.constant 0 : i32
    %c0_i32_2 = arith.constant 0 : i32
    return %arg0, %c0_i32, %c0_i32_0, %c0_i32_1 : i32, i32, i32, i32
  }
  func.func @transform_1(%arg0: i32) -> (i32, i32, i32) {
    %c0_i32 = arith.constant 0 : i32
    %c0_i32_0 = arith.constant 0 : i32
    %c0_i32_1 = arith.constant 0 : i32
    %c0_i32_2 = arith.constant 0 : i32
    return %c0_i32, %c0_i32_0, %c0_i32_1 : i32, i32, i32
  }
  func.func @transform_2(%arg0: i32) -> (i32, i32) {
    %c0_i32 = arith.constant 0 : i32
    %c0_i32_0 = arith.constant 0 : i32
    %c0_i32_1 = arith.constant 0 : i32
    return %c0_i32, %c0_i32_0 : i32, i32
  }
  func.func @transform_3(%arg0: i32) -> (i32, i32, i32, i32) {
    %c0_i32 = arith.constant 0 : i32
    %c0_i32_0 = arith.constant 0 : i32
    %c0_i32_1 = arith.constant 0 : i32
    %c0_i32_2 = arith.constant 0 : i32
    return %arg0, %c0_i32, %c0_i32_0, %c0_i32_1 : i32, i32, i32, i32
  }
}

</mosaic_0001>

<bundles_post_ra>
// kernel: tpu_custom_call.1
= control target key start
LH: loop header
LB: loop body
LE: loop exit
PB: predicated region body
PF: predicated region fallthrough
CT: control target
= control target key end

     0   :  { %8 = vsyncpa [#allocation3], 0  ;;  %s1332_s0 = inlined_call_operand.vmem [shape: f32[6,8,18,128], index: 0, kind: input, shape index: {}]   ;;  %s1333_s1 = inlined_call_operand.vmem [shape: f32[3,3,128], index: 1, kind: input, shape index: {}]   ;;  %s1334_s2 = inlined_call_operand.vmem [shape: f32[128,128], index: 2, kind: input, shape index: {}]   ;;  %s1335_s3 = inlined_call_operand.hbm [shape: f32[6,6,16,128], index: 3, kind: output, shape index: {}]  }
   0x1   :  { %10 = vsyncpa [#allocation3 + $0x1], 0  ;;  %s813_s12 = smov 0   ;;  %s815_s13 = smov 0  }
   0x2   :  { %s817_s14 = smov 0   ;;  %s819_s15 = smov 0  }
   0x3 LB: > { %s834_s16 = sadd.s32 4294967295, %s789_s15   ;;  %s612_s17 = sadd.s32 4294967294, %s789_s15   ;;  %s789_s15 = sphi %s819_s15, %s1371_s15   ;;  %s785_s14 = sphi %s817_s14, %s1370_s14   ;;  %s781_s13 = sphi %s815_s13, %s1369_s13   ;;  %s777_s12 = sphi %s813_s12, %s1368_s12  }
   0x4   : > { %s838_s18 = sadd.s32 1, %s789_s15   ;;  %s91_s19 = sadd.s32 1, %s785_s14 }
   0x5   : > { %s88_s20 = ssub.s32 %s789_s15, %s838_s18  ;;  %p101_p0 = scmp.ne.s32.totalorder %s785_s14, %s781_s13 }
   0x6   : > { %p89_p1 = scmp.eq.s32.totalorder %s88_s20, 0  ;;  %p102_p2 = scmp.eq.s32.totalorder %s834_s16, 5 }
   0x7   : > { %p107_p3 = scmp.ne.s32.totalorder %s781_s13, %s777_s12  ;;  %p108_p4 = scmp.eq.s32.totalorder %s612_s17, 5 }
   0x8   : > { %s849_s21 = scalar_select %p89_p1, %s785_s14, %s91_s19  }
   0x9   : > { %p851_p5 = por %p102_p2, %p101_p0  ;;  %p855_p6 = por %p108_p4, %p107_p3 }
   0xa   : > { %p615_p7 = scmp.ge.s32.totalorder %s789_s15, 1  ;;  %p140_p8 = scmp.lt.s32.totalorder %s789_s15, 7 }
   0xc   : > { %p141_p9 = pnand %p615_p7, %p140_p8 }
   0xe   : > { %144 = sbr.rel (%p141_p9) target bundleno = 226 (0xe2), region = 32 }
  0x13   : > { %v468_v0 = vld [vmem:[%s1334_s2 + $0x78] sm:$0xff]  ;;  %v467_v1 = vld [vmem:[%s1334_s2 + $0x70] sm:$0xff]  ;;  %p164_p10 = scmp.lt.s32.totalorder %s834_s16, 5  ;;  %v466_v2 = vld [vmem:[%s1334_s2 + $0x68] sm:$0xff]  ;;  %s676_s29 = smul.u32 96, %s834_s16 }
  0x14   : > { %627 = vmatpush.msra.mxu2 %v468_v0  ;;  %628 = vmatpush.msra.mxu3 %v468_v0  ;;  %v465_v3 = vld [vmem:[%s1334_s2 + $0x60] sm:$0xff]  ;;  %v464_v4 = vld [vmem:[%s1334_s2 + $0x58] sm:$0xff]  ;;  %v463_v6 = vld [vmem:[%s1334_s2 + $0x50] sm:$0xff]  ;;  %s747_s17 = scalar_lea.hbm %s1335_s3, 576 }
  0x15   : > { %469 = vmatpush.msra.mxu0 %v468_v0  ;;  %626 = vmatpush.msra.mxu1 %v468_v0  ;;  %s165_s30 = scalar_select %p164_p10, %s834_s16, 5  ;;  %v881_v5 = vld [vmem:[%s1333_s1] ss:$0 sm:$0xff]  ;;  %v894_v7 = vld [vmem:[%s1333_s1 + $0x4] ss:$0 sm:$0xff]  ;;  %v462_v11 = vld [vmem:[%s1334_s2 + $0x48] sm:$0xff] }
  0x16   : > { %630 = vmatpush.msra.mxu2 %v467_v1  ;;  %631 = vmatpush.msra.mxu3 %v467_v1  ;;  %v915_v14 = vld [vmem:[%s1333_s1 + $0x8] ss:$0 sm:$0xff]  ;;  %v926_v17 = vld [vmem:[%s1333_s1 + $0x1] ss:$0 sm:$0xff]  ;;  %v933_v20 = vld [vmem:[%s1333_s1 + $0x5] ss:$0 sm:$0xff]  ;;  %s546_s5 = scalar_lea.hbm %s1335_s3, %s676_s29 }
  0x17   : > { %470 = vmatpush.msra.mxu0 %v467_v1  ;;  %629 = vmatpush.msra.mxu1 %v467_v1  ;;  %s675_s6 = smul.u32 192, %s165_s30  ;;  %v461_v21 = vld [vmem:[%s1334_s2 + $0x40] sm:$0xff]  ;;  %v946_v24 = vld [vmem:[%s1333_s1 + $0x9] ss:$0 sm:$0xff]  ;;  %v460_v25 = vld [vmem:[%s1334_s2 + $0x38] sm:$0xff]  ;;  %s549_s7 = sshll.u32 %s546_s5, 4  ;;  %s550_s7 = int_to_ptr.hbm [resolvable:$true] %s549_s7 }
  0x18   : > { %633 = vmatpush.msra.mxu2 %v466_v2  ;;  %634 = vmatpush.msra.mxu3 %v466_v2  ;;  %v959_v29 = vld [vmem:[%s1333_s1 + $0x2] ss:$0 sm:$0xff]  ;;  %v967_v31 = vld [vmem:[%s1333_s1 + $0x6] ss:$0 sm:$0xff]  ;;  %v982_v36 = vld [vmem:[%s1333_s1 + $0xa] ss:$0 sm:$0xff] }
  0x19   : > { %471 = vmatpush.msra.mxu0 %v466_v2  ;;  %632 = vmatpush.msra.mxu1 %v466_v2  ;;  %s889_s24 = scalar_lea.vmem %s1332_s0, %s675_s6  ;;  %v459_v46 = vld [vmem:[%s1334_s2 + $0x30] sm:$0xff]  ;;  %v458_v57 = vld [vmem:[%s1334_s2 + $0x28] sm:$0xff]  ;;  %s741_s16 = sshra.s32 %s550_s7, 4  ;;  %s742_s16 = int_to_ptr.hbm [resolvable:$true] %s741_s16 }
  0x1a   : > { %636 = vmatpush.msra.mxu2 %v465_v3  ;;  %637 = vmatpush.msra.mxu3 %v465_v3  ;;  %v897_v8 = vld [vmem:[%s889_s24 + $0x48] sm:$0xff]  ;;  %v900_v9 = vld [vmem:[%s889_s24 + $0x60] sm:$0xff]  ;;  %v903_v10 = vld [vmem:[%s889_s24 + $0x78] sm:$0xff]  ;;  %s743_s9 = scalar_lea.hbm %s742_s16, 96  ;;  %p748_p0 = scmp.lt.s32.totalorder %s742_s16, %s1335_s3 }
  0x1b   : > { %1348 = vst [vmem:[#allocation5_spill] sm:$0xff] %v897_v8  ;;  %472 = vmatpush.msra.mxu0 %v465_v3  ;;  %635 = vmatpush.msra.mxu1 %v465_v3  ;;  %v193_v12 = vmul.f32 %v881_v5, %v897_v8  ;;  %v220_v13 = vmul.f32 %v894_v7, %v900_v9  ;;  %v918_v15 = vld [vmem:[%s889_s24 + $0x49] sm:$0xff]  ;;  %v921_v16 = vld [vmem:[%s889_s24 + $0x61] sm:$0xff]  ;;  %v939_v22 = vld [vmem:[%s889_s24 + $0x79] sm:$0xff]  ;;  %p744_p11 = scmp.ne.s32.totalorder %s742_s16, %s743_s9  ;;  %p749_p1 = scmp.lt.s32.totalorder %s747_s17, %s743_s9 }
  0x1c   : > { %639 = vmatpush.msra.mxu2 %v464_v4  ;;  %640 = vmatpush.msra.mxu3 %v464_v4  ;;  %v247_v19 = vmul.f32 %v915_v14, %v903_v10  ;;  %v289_v23 = vmul.f32 %v926_v17, %v918_v15  ;;  %v315_v27 = vmul.f32 %v933_v20, %v921_v16  ;;  %v954_v28 = vld [vmem:[%s889_s24 + $0x4a] sm:$0xff]  ;;  %v962_v30 = vld [vmem:[%s889_s24 + $0x62] sm:$0xff]  ;;  %v995_v40 = vld [vmem:[%s889_s24 + $0x7a] sm:$0xff] }
  0x1d   : > { %473 = vmatpush.msra.mxu0 %v464_v4  ;;  %638 = vmatpush.msra.mxu1 %v464_v4  ;;  %v232_v18 = vadd.f32 %v220_v13, %v193_v12  ;;  %v971_v32 = vmul.f32 %v881_v5, %v903_v10  ;;  %v975_v33 = vmul.f32 %v894_v7, %v897_v8  ;;  %v985_v37 = vld [vmem:[%s889_s24 + $0x68] sm:$0xff]  ;;  %v988_v38 = vld [vmem:[%s889_s24 + $0x80] sm:$0xff]  ;;  %v998_v41 = vld [vmem:[%s889_s24 + $0x98] sm:$0xff]  ;;  %p745_p12 = pnand %p744_p11, %p851_p5  ;;  %p750_p2 = por %p749_p1, %p748_p0 }
  0x1e   : > { %642 = vmatpush.msra.mxu2 %v463_v6  ;;  %643 = vmatpush.msra.mxu3 %v463_v6  ;;  %v341_v35 = vmul.f32 %v946_v24, %v939_v22  ;;  %1349 = vst [vmem:[#allocation6_spill] sm:$0xff] %v985_v37  ;;  %v992_v39 = vmul.f32 %v926_v17, %v939_v22  ;;  %v1005_v44 = vld [vmem:[%s889_s24 + $0x69] sm:$0xff]  ;;  %v1019_v50 = vld [vmem:[%s889_s24 + $0x81] sm:$0xff]  ;;  %v1022_v51 = vld [vmem:[%s889_s24 + $0x99] sm:$0xff] }
  0x1f   : > { %474 = vmatpush.msra.mxu0 %v463_v6  ;;  %641 = vmatpush.msra.mxu1 %v463_v6  ;;  %v259_v26 = vadd.f32 %v247_v19, %v232_v18  ;;  %v196_v42 = vmul.f32 %v881_v5, %v985_v37  ;;  %v223_v43 = vmul.f32 %v894_v7, %v988_v38  ;;  %v169_v54 = vld [vmem:[%s889_s24] sm:$0xff]  ;;  %v1028_v55 = vld [vmem:[%s889_s24 + $0x18] sm:$0xff]  ;;  %v1042_v61 = vld [vmem:[%s889_s24 + $0x6a] sm:$0xff]  ;;  %p746_p13 = pneg %p745_p12 }
  0x20   : > { %645 = vmatpush.msra.mxu2 %v462_v11  ;;  %646 = vmatpush.msra.mxu3 %v462_v11  ;;  %1350 = vst [vmem:[#allocation7_spill] sm:$0xff] %v1005_v44  ;;  %v1009_v45 = vmul.f32 %v915_v14, %v900_v9  ;;  %v383_v48 = vmul.f32 %v959_v29, %v954_v28  ;;  %v1045_v62 = vld [vmem:[%s889_s24 + $0x30] sm:$0xff]  ;;  %v1052_v2 = vld [vmem:[%s889_s24 + $0x82] sm:$0xff] }
  0x21   : > { %475 = vmatpush.msra.mxu0 %v462_v11  ;;  %644 = vmatpush.msra.mxu1 %v462_v11  ;;  %v301_v34 = vadd.f32 %v289_v23, %v259_v26  ;;  %v250_v49 = vmul.f32 %v915_v14, %v998_v41  ;;  %v235_v52 = vadd.f32 %v223_v43, %v196_v42  ;;  %v265_v3 = vld [vmem:[%s889_s24 + $0x1] sm:$0xff]  ;;  %v1072_v23 = vld [vmem:[%s889_s24 + $0x31] sm:$0xff]  ;;  %p751_p3 = pnand %p750_p2, %p746_p13 }
  0x22   : > { %648 = vmatpush.msra.mxu2 %v461_v21  ;;  %649 = vmatpush.msra.mxu3 %v461_v21  ;;  %v292_v53 = vmul.f32 %v926_v17, %v1005_v44  ;;  %v1032_v56 = vmul.f32 %v881_v5, %v900_v9  ;;  %v409_v59 = vmul.f32 %v967_v31, %v962_v30  ;;  %v457_v4 = vld [vmem:[%s1334_s2 + $0x20] sm:$0xff] }
  0x23   : > { %476 = vmatpush.msra.mxu0 %v461_v21  ;;  %647 = vmatpush.msra.mxu1 %v461_v21  ;;  %v327_v47 = vadd.f32 %v315_v27, %v301_v34  ;;  %v435_v60 = vmul.f32 %v982_v36, %v995_v40  ;;  %1351 = vst [vmem:[#allocation8_spill] sm:$0xff] %v1042_v61  ;;  %v1059_v9 = vld [vmem:[%s889_s24 + $0x9a] sm:$0xff] }
  0x24   : > { %651 = vmatpush.msra.mxu2 %v460_v25  ;;  %652 = vmatpush.msra.mxu3 %v460_v25  ;;  %v262_v63 = vadd.f32 %v250_v49, %v235_v52  ;;  %v318_v0 = vmul.f32 %v933_v20, %v1019_v50  ;;  %v344_v1 = vmul.f32 %v946_v24, %v1022_v51  ;;  %v1069_v21 = vld [vmem:[%s889_s24 + $0x19] sm:$0xff]  ;;  %v1090_v49 = vld [vmem:[%s889_s24 + $0x50] sm:$0xff] }
  0x25   : > { %477 = vmatpush.msra.mxu0 %v460_v25  ;;  %650 = vmatpush.msra.mxu1 %v460_v25  ;;  %v353_v58 = vadd.f32 %v341_v35, %v327_v47  ;;  %1352 = vst [vmem:[#allocation9_spill] sm:$0xff] %v1059_v9  ;;  %v187_v11 = vmul.f32 %v881_v5, %v169_v54  ;;  %v456_v25 = vld [vmem:[%s1334_s2 + $0x18] sm:$0xff]  ;;  %v359_v35 = vld [vmem:[%s889_s24 + $0x2] sm:$0xff]  ;;  %v455_v52 = vld [vmem:[%s1334_s2 + $0x10] sm:$0xff] }
  0x26   : > { %654 = vmatpush.msra.mxu2 %v459_v46  ;;  %655 = vmatpush.msra.mxu3 %v459_v46  ;;  %v214_v12 = vmul.f32 %v894_v7, %v1028_v55  ;;  %v304_v13 = vadd.f32 %v292_v53, %v262_v63  ;;  %v386_v18 = vmul.f32 %v959_v29, %v1042_v61  ;;  %v1082_v42 = vld [vmem:[%s889_s24 + $0x20] sm:$0xff] }
  0x27   : > { %478 = vmatpush.msra.mxu0 %v459_v46  ;;  %653 = vmatpush.msra.mxu1 %v459_v46  ;;  %v395_v6 = vadd.f32 %v383_v48, %v353_v58  ;;  %v241_v19 = vmul.f32 %v915_v14, %v1045_v62  ;;  %1353 = vst [vmem:[#allocation10_spill] sm:$0xff] %v1069_v21  ;;  %v1087_v48 = vld [vmem:[%s889_s24 + $0x38] sm:$0xff] }
  0x28   : > { %657 = vmatpush.msra.mxu2 %v458_v57  ;;  %658 = vmatpush.msra.mxu3 %v458_v57  ;;  %v412_v26 = vmul.f32 %v967_v31, %v1052_v2  ;;  %v226_v27 = vadd.f32 %v214_v12, %v187_v11  ;;  %v283_v34 = vmul.f32 %v926_v17, %v265_v3  ;;  %v1100_v58 = vld [vmem:[%s889_s24 + $0x1a] sm:$0xff]  ;;  %v1112_v11 = vld [vmem:[%s889_s24 + $0x32] sm:$0xff] }
  0x29   : > { %479 = vmatpush.msra.mxu0 %v458_v57  ;;  %656 = vmatpush.msra.mxu1 %v458_v57  ;;  %v421_v43 = vadd.f32 %v409_v59, %v395_v6  ;;  %v330_v46 = vadd.f32 %v318_v0, %v304_v13  ;;  %v438_v47 = vmul.f32 %v982_v36, %v1059_v9  ;;  %v1106_v3 = vld [vmem:[%s889_s24 + $0x21] sm:$0xff]  ;;  %v1119_v13 = vld [vmem:[%s889_s24 + $0x39] sm:$0xff] }
  0x2a   : > { %660 = vmatpush.msra.mxu2 %v457_v4  ;;  %661 = vmatpush.msra.mxu3 %v457_v4  ;;  %1354 = vst [vmem:[#allocation11_spill] sm:$0xff] %v1090_v49  ;;  %v253_v53 = vadd.f32 %v241_v19, %v226_v27  ;;  %v309_v54 = vmul.f32 %v933_v20, %v1069_v21 }
  0x2b   : > { %480 = vmatpush.msra.mxu0 %v457_v4  ;;  %659 = vmatpush.msra.mxu1 %v457_v4  ;;  %v335_v57 = vmul.f32 %v946_v24, %v1072_v23  ;;  %1355 = vst [vmem:[#allocation12_spill] sm:$0xff] %v1100_v58  ;;  %v356_v59 = vadd.f32 %v344_v1, %v330_v46  ;;  %v454_v4 = vld [vmem:[%s1334_s2 + $0x8] sm:$0xff] }
  0x2c   : > { %663 = vmatpush.msra.mxu2 %v456_v25  ;;  %664 = vmatpush.msra.mxu3 %v456_v25  ;;  %v377_v63 = vmul.f32 %v959_v29, %v359_v35  ;;  %v190_v0 = vmul.f32 %v881_v5, %v1082_v42  ;;  %v295_v6 = vadd.f32 %v283_v34, %v253_v53 }
  0x2d   : > { %481 = vmatpush.msra.mxu0 %v456_v25  ;;  %662 = vmatpush.msra.mxu1 %v456_v25  ;;  %v217_v12 = vmul.f32 %v894_v7, %v1087_v48  ;;  %v244_v1 = vmul.f32 %v915_v14, %v1090_v49  ;;  %v447_v19 = vadd.f32 %v435_v60, %v421_v43  ;;  %v453_v25 = vld [vmem:[%s1334_s2] sm:$0xff] }
  0x2e   : > { %666 = vmatpush.msra.mxu2 %v455_v52  ;;  %667 = vmatpush.msra.mxu3 %v455_v52  ;;  %v398_v27 = vadd.f32 %v386_v18, %v356_v59  ;;  %v403_v35 = vmul.f32 %v967_v31, %v1100_v58  ;;  %v321_v34 = vadd.f32 %v309_v54, %v295_v6  ;;  %v1131_v18 = vld [vmem:[%s889_s24 + $0x51] sm:$0xff] }
  0x2f   : > { %482 = vmatpush.msra.mxu0 %v455_v52  ;;  %665 = vmatpush.msra.mxu1 %v455_v52  ;;  %v229_v46 = vadd.f32 %v217_v12, %v190_v0  ;;  %v286_v53 = vmul.f32 %v926_v17, %v1106_v3  ;;  %v429_v60 = vmul.f32 %v982_v36, %v1112_v11  ;;  %v1138_v0 = vld [vmem:[%s889_s24 + $0x22] sm:$0xff]  ;;  %v277_v58 = vld [vmem:[%s889_s24 + $0x91] sm:$0xff] }
  0x30   : > { %669 = vmatpush.msra.mxu2 %v454_v4  ;;  %670 = vmatpush.msra.mxu3 %v454_v4  ;;  %v424_v9 = vadd.f32 %v412_v26, %v398_v27  ;;  %1356 = vst [vmem:[#allocation13_spill] sm:$0xff] %v1131_v18  ;;  %v312_v43 = vmul.f32 %v933_v20, %v1119_v13 }
  0x31   : > { %483 = vmatpush.msra.mxu0 %v454_v4  ;;  %668 = vmatpush.msra.mxu1 %v454_v4  ;;  %v347_v52 = vadd.f32 %v335_v57, %v321_v34  ;;  %v256_v54 = vadd.f32 %v244_v1, %v229_v46  ;;  %v338_v59 = vmul.f32 %v946_v24, %v1131_v18  ;;  %v1145_v1 = vld [vmem:[%s889_s24 + $0x3a] sm:$0xff]  ;;  %v1150_v34 = vld [vmem:[%s889_s24 + $0x90] sm:$0xff]  ;;  %v183_v46 = vld [vmem:[%s889_s24 + $0xa8] sm:$0xff] }
  0x32   : > { %672 = vmatpush.msra.mxu2 %v453_v25  ;;  %673 = vmatpush.msra.mxu3 %v453_v25  ;;  %v450_v26 = vadd.f32 %v438_v47, %v424_v9  ;;  %v194_v6 = vmul.f32 %v881_v5, %v1090_v49  ;;  %v221_v12 = vmul.f32 %v894_v7, %v985_v37  ;;  %v266_v49 = vld [vmem:[%s889_s24 + $0x9] sm:$0xff] }
  0x33   : > { %503 = vmatmul.f32.vlgmr.msra.gmra.mxu2 %v447_v19  ;;  %484 = vmatpush.msra.mxu0 %v453_v25  ;;  %v389_v57 = vadd.f32 %v377_v63, %v347_v52  ;;  %v298_v4 = vadd.f32 %v286_v53, %v256_v54  ;;  %v248_v27 = vmul.f32 %v915_v14, %v988_v38  ;;  %v1158_v52 = vld [vmem:[%s889_s24 + $0x52] sm:$0xff] }
  0x34   : > { %512 = vmatmul.f32.vlgmr.msra.gmra.mxu3 %v450_v26  ;;  %671 = vmatpush.msra.mxu1 %v453_v25  ;;  %v233_v9 = vadd.f32 %v221_v12, %v194_v6  ;;  %v290_v47 = vmul.f32 %v926_v17, %v1131_v18  ;;  %v222_v63 = vmul.f32 %v894_v7, %v903_v10 }
  0x35   : > { %v415_v19 = vadd.f32 %v403_v35, %v389_v57  ;;  %v324_v53 = vadd.f32 %v312_v43, %v298_v4  ;;  %1357 = vst [vmem:[#allocation14_spill] sm:$0xff] %v1158_v52  ;;  %v380_v54 = vmul.f32 %v959_v29, %v1138_v0  ;;  %v387_v25 = vmul.f32 %v959_v29, %v995_v40  ;;  %v170_v35 = vld [vmem:[%s889_s24 + $0x8] sm:$0xff] }
  0x36   : > { %v406_v26 = vmul.f32 %v967_v31, %v1145_v1  ;;  %v260_v6 = vadd.f32 %v248_v27, %v233_v9  ;;  %v316_v12 = vmul.f32 %v933_v20, %v1005_v44  ;;  %v224_v10 = vmul.f32 %v894_v7, %v1150_v34 }
  0x37   : > { %v441_v43 = vadd.f32 %v429_v60, %v415_v19  ;;  %v350_v57 = vadd.f32 %v338_v59, %v324_v53  ;;  %v432_v4 = vmul.f32 %v982_v36, %v1158_v52  ;;  %v251_v18 = vmul.f32 %v915_v14, %v183_v46  ;;  %v279_v19 = vld [vmem:[%s889_s24 + $0xa9] sm:$0xff]  ;;  %v1185_v53 = vld [vmem:[%s889_s24 + $0x92] sm:$0xff] }
  0x38   : > { %v302_v37 = vadd.f32 %v290_v47, %v260_v6  ;;  %v342_v27 = vmul.f32 %v946_v24, %v1019_v50  ;;  %v384_v9 = vmul.f32 %v959_v29, %v1158_v52  ;;  %v236_v44 = vadd.f32 %v224_v10, %v971_v32 }
  0x39   : > { %485 = vmatmul.f32.vlgmr.msra.gmra.mxu0 %v441_v43  ;;  %v392_v60 = vadd.f32 %v380_v54, %v350_v57  ;;  %v410_v59 = vmul.f32 %v967_v31, %v1042_v61  ;;  %v188_v47 = vmul.f32 %v881_v5, %v170_v35  ;;  %v215_v46 = vmul.f32 %v894_v7, %v1082_v42  ;;  %v373_v43 = vld [vmem:[%s889_s24 + $0xaa] sm:$0xff] }
  0x3a   : > { %v328_v6 = vadd.f32 %v316_v12, %v302_v37  ;;  %v263_v52 = vadd.f32 %v251_v18, %v236_v44  ;;  %v319_v21 = vmul.f32 %v933_v20, %v277_v58  ;;  %v242_v32 = vmul.f32 %v915_v14, %v1087_v48  ;;  %v360_v44 = vld [vmem:[%s889_s24 + $0xa] sm:$0xff] }
  0x3b   : > { %v418_v54 = vadd.f32 %v406_v26, %v392_v60  ;;  %v436_v10 = vmul.f32 %v982_v36, %v1052_v2  ;;  %v227_v57 = vadd.f32 %v215_v46, %v188_v47  ;;  %v284_v61 = vmul.f32 %v926_v17, %v266_v49 }
  0x3c   : > { %v354_v8 = vadd.f32 %v342_v27, %v328_v6  ;;  %v305_v35 = vadd.f32 %v992_v39, %v263_v52  ;;  %v345_v42 = vmul.f32 %v946_v24, %v279_v19  ;;  %v413_v37 = vmul.f32 %v967_v31, %v1185_v53 }
  0x3d   : > { %v444_v18 = vadd.f32 %v432_v4, %v418_v54  ;;  %v254_v12 = vadd.f32 %v242_v32, %v227_v57  ;;  %v310_v26 = vmul.f32 %v933_v20, %v1106_v3  ;;  %v191_v60 = vmul.f32 %v881_v5, %v1045_v62 }
  0x3e   : > { %v396_v47 = vadd.f32 %v384_v9, %v354_v8  ;;  %v331_v46 = vadd.f32 %v319_v21, %v305_v35  ;;  %v439_v49 = vmul.f32 %v982_v36, %v373_v43  ;;  %v336_v39 = vmul.f32 %v946_v24, %v1119_v13 }
  0x3f   : > { %494 = vmatmul.f32.vlgmr.msra.gmra.mxu1 %v444_v18  ;;  %v296_v52 = vadd.f32 %v284_v61, %v254_v12  ;;  %v378_v27 = vmul.f32 %v959_v29, %v360_v44  ;;  %v230_v4 = vadd.f32 %v975_v33, %v191_v60  ;;  %v287_v19 = vmul.f32 %v926_v17, %v1072_v23 }
  0x40   : > { %v422_v3 = vadd.f32 %v410_v59, %v396_v47  ;;  %v357_v6 = vadd.f32 %v345_v42, %v331_v46  ;;  %v404_v8 = vmul.f32 %v967_v31, %v1138_v0  ;;  %v313_v21 = vmul.f32 %v933_v20, %v918_v15 }
  0x41   : > { %v322_v9 = vadd.f32 %v310_v26, %v296_v52  ;;  %v257_v32 = vadd.f32 %v1009_v45, %v230_v4  ;;  %v234_v61 = vadd.f32 %v222_v63, %v1032_v56  ;;  %v249_v33 = vmul.f32 %v915_v14, %v1150_v34  ;;  %v184_v45 = vld [vmem:[%s889_s24 + $0xb0] sm:$0xff] }
  0x42   : > { %v448_v54 = vadd.f32 %v436_v10, %v422_v3  ;;  %v399_v43 = vadd.f32 %v387_v25, %v357_v6  ;;  %v339_v59 = vmul.f32 %v946_v24, %v921_v16  ;;  %v291_v57 = vmul.f32 %v926_v17, %v921_v16  ;;  %v280_v3 = vld [vmem:[%s889_s24 + $0xb1] sm:$0xff] }
  0x43   : > { %v348_v0 = vadd.f32 %v336_v39, %v322_v9  ;;  %v299_v35 = vadd.f32 %v287_v19, %v257_v32  ;;  %v261_v42 = vadd.f32 %v249_v33, %v234_v61  ;;  %v317_v44 = vmul.f32 %v933_v20, %v939_v22 }
  0x44   : > { %506 = vmatmul.f32.gmra.mxu2 %v448_v54  ;;  %v425_v56 = vadd.f32 %v413_v37, %v399_v43  ;;  %v430_v34 = vmul.f32 %v982_v36, %v1145_v1  ;;  %v381_v63 = vmul.f32 %v959_v29, %v1112_v11  ;;  %v343_v25 = vmul.f32 %v946_v24, %v277_v58  ;;  %v1359_v43 = vld [vmem:[#allocation10_spill] sm:$0xff] }
  0x45   : > { %v390_v10 = vadd.f32 %v378_v27, %v348_v0  ;;  %v325_v18 = vadd.f32 %v313_v21, %v299_v35  ;;  %v303_v16 = vadd.f32 %v291_v57, %v261_v42  ;;  %v198_v12 = vmul.f32 %v881_v5, %v988_v38  ;;  %v374_v42 = vld [vmem:[%s889_s24 + $0xb2] sm:$0xff]  ;;  %s161_s24 = sand.u32 1, %s781_s13  }
  0x46   : > { %v451_v26 = vadd.f32 %v439_v49, %v425_v56  ;;  %v407_v22 = vmul.f32 %v967_v31, %v954_v28  ;;  %v225_v37 = vmul.f32 %v894_v7, %v998_v41  ;;  %v252_v60 = vmul.f32 %v915_v14, %v184_v45  ;;  %v1360_v45 = vld [vmem:[#allocation11_spill] sm:$0xff]  ;;  %s674_s27 = smul.u32 96, %s161_s24  ;;  %s535_s8 = scalar_lea.sflag [#allocation3], %s161_s24 }
  0x47   : > { %v416_v47 = vadd.f32 %v404_v8, %v390_v10  ;;  %v351_v46 = vadd.f32 %v339_v59, %v325_v18  ;;  %v329_v39 = vadd.f32 %v317_v44, %v303_v16  ;;  %v385_v58 = vmul.f32 %v959_v29, %v962_v30  ;;  %v1362_v10 = vld [vmem:[#allocation6_spill] sm:$0xff] }
  0x48   : > { %515 = vmatmul.f32.gmra.mxu3 %v451_v26  ;;  %v433_v38 = vmul.f32 %v982_v36, %v962_v30  ;;  %v411_v49 = vmul.f32 %v967_v31, %v995_v40  ;;  %v237_v52 = vadd.f32 %v225_v37, %v198_v12  ;;  %v294_v27 = vmul.f32 %v926_v17, %v1019_v50  ;;  %v1358_v40 = vld [vmem:[#allocation5_spill] sm:$0xff]  ;;  %s163_s28 = scalar_lea.vmem [#allocation2], %s674_s27 }
  0x49   : > { %v442_v41 = vadd.f32 %v430_v34, %v416_v47  ;;  %v393_v4 = vadd.f32 %v381_v63, %v351_v46  ;;  %v355_v19 = vadd.f32 %v343_v25, %v329_v39  ;;  %v320_v6 = vmul.f32 %v933_v20, %v1022_v51  ;;  %v1361_v63 = vld [vmem:[#allocation9_spill] sm:$0xff]  ;;  %s547_s6 = sshll.u32 %s163_s28, 4  ;;  %s548_s6 = int_to_ptr.vmem [resolvable:$true] %s547_s6 }
  0x4a   : > { %v264_v8 = vadd.f32 %v252_v60, %v237_v52  ;;  %v189_v21 = vmul.f32 %v881_v5, %v1028_v55  ;;  %v216_v30 = vmul.f32 %v894_v7, %v1045_v62  ;;  %v243_v9 = vmul.f32 %v915_v14, %v1358_v40  ;;  %v1364_v47 = vld [vmem:[#allocation13_spill] sm:$0xff] }
  0x4b   : > { %488 = vmatmul.f32.gmra.mxu0 %v442_v41  ;;  %v419_v50 = vadd.f32 %v407_v22, %v393_v4  ;;  %v397_v32 = vadd.f32 %v385_v58, %v355_v19  ;;  %v437_v61 = vmul.f32 %v982_v36, %v1185_v53  ;;  %v346_v51 = vmul.f32 %v946_v24, %v280_v3  ;;  %v1366_v4 = vld [vmem:[#allocation14_spill] sm:$0xff] }
  0x4c   : > { %v306_v33 = vadd.f32 %v294_v27, %v264_v8  ;;  %v228_v54 = vadd.f32 %v216_v30, %v189_v21  ;;  %v285_v55 = vmul.f32 %v926_v17, %v1359_v43  ;;  %v388_v62 = vmul.f32 %v959_v29, %v1052_v2 }
  0x4d   : > { %v445_v59 = vadd.f32 %v433_v38, %v419_v50  ;;  %v423_v57 = vadd.f32 %v411_v49, %v397_v32  ;;  %v311_v0 = vmul.f32 %v933_v20, %v1072_v23  ;;  %v192_v53 = vmul.f32 %v881_v5, %v1087_v48  ;;  %v1363_v48 = vld [vmem:[#allocation12_spill] sm:$0xff]  ;;  %v1365_v38 = vld [vmem:[#allocation7_spill] sm:$0xff] }
  0x4e   : > { %v332_v35 = vadd.f32 %v320_v6, %v306_v33  ;;  %v255_v44 = vadd.f32 %v243_v9, %v228_v54  ;;  %v219_v56 = vmul.f32 %v894_v7, %v1360_v45  ;;  %v414_v25 = vmul.f32 %v967_v31, %v1361_v63 }
  0x4f   : > { %497 = vmatmul.f32.gmra.mxu1 %v445_v59  ;;  %v449_v34 = vadd.f32 %v437_v61, %v423_v57  ;;  %v337_v2 = vmul.f32 %v946_v24, %v918_v15  ;;  %v246_v23 = vmul.f32 %v915_v14, %v1362_v10  ;;  %v288_v5 = vmul.f32 %v926_v17, %v1119_v13 }
  0x50   : > { %v358_v18 = vadd.f32 %v346_v51, %v332_v35  ;;  %v297_v16 = vadd.f32 %v285_v55, %v255_v44  ;;  %v231_v12 = vadd.f32 %v219_v56, %v192_v53  ;;  %v440_v7 = vmul.f32 %v982_v36, %v374_v42 }
  0x51   : > { %509 = vmatmul.f32.gmra.mxu2 %v449_v34  ;;  %v379_v26 = vmul.f32 %v959_v29, %v1363_v48  ;;  %v314_v15 = vmul.f32 %v933_v20, %v1364_v47  ;;  %v405_v14 = vmul.f32 %v967_v31, %v1112_v11  ;;  %v340_v17 = vmul.f32 %v946_v24, %v1365_v38  ;;  %v1367_v24 = vld [vmem:[#allocation8_spill] sm:$0xff] }
  0x52   : > { %v400_v22 = vadd.f32 %v388_v62, %v358_v18  ;;  %v323_v37 = vadd.f32 %v311_v0, %v297_v16  ;;  %v258_v60 = vadd.f32 %v246_v23, %v231_v12  ;;  %v431_v13 = vmul.f32 %v982_v36, %v954_v28 }
  0x53   : > { %v382_v20 = vmul.f32 %v959_v29, %v1145_v1  ;;  %v408_v19 = vmul.f32 %v967_v31, %v1366_v4  ;;  %v434_v8 = vmul.f32 %v982_v36, %v1367_v24 }
  0x54   : > { %v426_v46 = vadd.f32 %v414_v25, %v400_v22  ;;  %v349_v39 = vadd.f32 %v337_v2, %v323_v37  ;;  %v300_v58 = vadd.f32 %v288_v5, %v258_v60 }
  0x56   : > { %v452_v49 = vadd.f32 %v440_v7, %v426_v46  ;;  %v391_v52 = vadd.f32 %v379_v26, %v349_v39  ;;  %v326_v27 = vadd.f32 %v314_v15, %v300_v58 }
  0x58   : > { %518 = vmatmul.f32.gmra.mxu3 %v452_v49  ;;  %v417_v41 = vadd.f32 %v405_v14, %v391_v52  ;;  %v352_v11 = vadd.f32 %v340_v17, %v326_v27 }
  0x5a   : > { %v443_v3 = vadd.f32 %v431_v13, %v417_v41  ;;  %v394_v6 = vadd.f32 %v382_v20, %v352_v11 }
  0x5c   : > { %491 = vmatmul.f32.gmra.mxu0 %v443_v3  ;;  %v420_v28 = vadd.f32 %v408_v19, %v394_v6 }
  0x5e   : > { %v446_v21 = vadd.f32 %v434_v8, %v420_v28 }
  0x60   : > { %500 = vmatmul.f32.gmra.mxu1 %v446_v21 }
  0xb6   : > { %v486_v30 = vpop.f32.mrf.mxu0  ;;  %v504_v29 = vpop.f32.mrf.mxu2 }
  0xb7   : > { %522 = vst [vmem:[%s163_s28] sm:$0xff] %v486_v30  ;;  %v513_v1 = vpop.f32.mrf.mxu3 }
  0xb8   : > { %528 = vst [vmem:[%s163_s28 + $0x30] sm:$0xff] %v504_v29 }
  0xb9   : > { %531 = vst [vmem:[%s163_s28 + $0x48] sm:$0xff] %v513_v1 }
  0xbc   : > { %v495_v31 = vpop.f32.mrf.mxu1 }
  0xbd   : > { %525 = vst [vmem:[%s163_s28 + $0x18] sm:$0xff] %v495_v31 }
  0xc7   : > { %v507_v40 = vpop.f32.mrf.mxu2 }
  0xc8   : > { %v489_v9 = vpop.f32.mrf.mxu0  ;;  %529 = vst [vmem:[%s163_s28 + $0x38] sm:$0xff] %v507_v40 }
  0xc9   : > { %523 = vst [vmem:[%s163_s28 + $0x8] sm:$0xff] %v489_v9 }
  0xcb   : > { %v516_v36 = vpop.f32.mrf.mxu3 }
  0xcc   : > { %v498_v50 = vpop.f32.mrf.mxu1  ;;  %532 = vst [vmem:[%s163_s28 + $0x50] sm:$0xff] %v516_v36 }
  0xcd   : > { %526 = vst [vmem:[%s163_s28 + $0x20] sm:$0xff] %v498_v50 }
  0xd4   : > { %v510_v32 = vpop.f32.mrf.mxu2 }
  0xd5   : > { %530 = vst [vmem:[%s163_s28 + $0x40] sm:$0xff] %v510_v32 }
  0xd9   : > { %v492_v61 = vpop.f32.mrf.mxu0 }
  0xda   : > { %524 = vst [vmem:[%s163_s28 + $0x10] sm:$0xff] %v492_v61 }
  0xdb   : > { %v519_v33 = vpop.f32.mrf.mxu3 }
  0xdc   : > { %533 = vst [vmem:[%s163_s28 + $0x58] sm:$0xff] %v519_v33 }
  0xdd   : > { %v501_v51 = vpop.f32.mrf.mxu1 }
  0xde   : > { %527 = vst [vmem:[%s163_s28 + $0x28] sm:$0xff] %v501_v51 }
  0xdf   : > { %754 = shalt.err (!%p751_p3)
}
  0xe0   : > { %s791_s25 = smov 128   ;;  %s792_s26 = smov 8  }
  0xe1   : > { %677 = dma.vmem_to_hbm [thread:$0]  (%p851_p5), %s548_s6, 1536, %s550_s7, %s535_s8, %s791_s25, %s791_s25, %s792_s26  }
  0xe2 PF: > { %p683_p4 = scmp.ge.s32.totalorder %s789_s15, 2  ;;  %s564_s24 = sand.u32 1, %s777_s12  }
  0xe3   : > { %s565_s27 = scalar_lea.sflag [#allocation3], %s564_s24 }
  0xe4   : > { %p680_p7 = pnand %p683_p4, %p855_p6 }
  0xe6   : > { %p681_p8 = pneg %p680_p7 }
  0xe8   : > { %772 = dma.done.wait (%p681_p8), %s565_s27, 1536  }
  0xe9   : > { %774 = vsyncadd (%p681_p8), %s565_s27, 4294965760  ;;  %p13_p9 = scmp.ge.s32.totalorder %s838_s18, 8   ;;  %s1368_s12 = smov %s781_s13 }
  0xea   : > { %s1369_s13 = smov %s785_s14  ;;  %s1370_s14 = smov %s849_s21 }
  0xeb   : > { %s1371_s15 = smov %s838_s18  ;;  %15 = sbr.rel (!%p13_p9) target bundleno = 3 (0x3), region = 69 }
  0xf0   :  { %571 = vsyncpa [#allocation3], 1 }
  0xf1   :  { %573 = vsyncpa [#allocation3 + $0x1], 1 }

</bundles_post_ra>
